<compile_context>
chip_gen: v6e
topology: v6e:2x2x1
jax: 0.10.0
libtpu: 0.0.40
codegen_flags: <defaults>
</compile_context>

<pallas_src>
import functools

import jax
import jax.numpy as jnp
from jax.experimental import pallas as pl
from jax.experimental.pallas import tpu as pltpu

LANES = 128
SUBLANES = 8
# 8192 rows x 128 lanes x 4 B = 4 MiB per input per pipeline buffer ->
# 16 MiB double-buffered for both inputs.  Safe on v5e/v6e/v7x with the
# explicit 32 MiB vmem limit below (<= ~16 MiB per-core working set on v7x).
MAX_TILE_ROWS = 8192
VMEM_LIMIT_BYTES = 32 * 1024 * 1024
NEG_LOGIT_PAD = -1e4  # sigmoid(NEG_LOGIT_PAD) == 0.0 exactly in f32


def _iou_kernel(x_ref, t_ref, inter_ref, total_ref, *,
                tile_rows, num_blocks, blocks_per_slice, num_slices,
                valid_rows_last):
    """Accumulate per-slice IoU partial sums.

    x_ref, t_ref : (tile_rows, 128) VMEM tiles of logits / targets
    inter_ref    : (8, 128) per-slice output accumulator for sum(p * t)
    total_ref    : (8, 128) per-slice output accumulator for sum(p + t)
    """
    c = pl.program_id(0)                     # slice (TensorCore) index
    k = pl.program_id(1)                     # block index within the slice
    block_id = c * blocks_per_slice + k      # global row-block index

    @pl.when(k == 0)
    def _init():
        inter_ref[...] = jnp.zeros_like(inter_ref)
        total_ref[...] = jnp.zeros_like(total_ref)

    n_groups = tile_rows // SUBLANES

    def accumulate(apply_row_mask):
        x = x_ref[...].astype(jnp.float32)
        t = t_ref[...].astype(jnp.float32)
        # sigmoid(x) = 0.5 * (tanh(x/2) + 1): one EUP transcendental / element.
        p = 0.5 * (jnp.tanh(0.5 * x) + 1.0)
        if apply_row_mask:
            # Only the ragged last block needs masking (rows beyond the true
            # row count read Pallas padding / garbage).  Lane padding was done
            # with neutral values in the wrapper, so no lane mask is needed.
            row_ids = jax.lax.broadcasted_iota(jnp.int32, (tile_rows, LANES), 0)
            keep = row_ids < valid_rows_last
            p = jnp.where(keep, p, 0.0)
            t = jnp.where(keep, t, 0.0)
        # Leading-axis fold onto one (8, 128) vreg: pure VPU adds.
        inter_ref[...] += jnp.sum(
            (p * t).reshape(n_groups, SUBLANES, LANES), axis=0)
        total_ref[...] += jnp.sum(
            (p + t).reshape(n_groups, SUBLANES, LANES), axis=0)

    last_is_ragged = valid_rows_last != tile_rows                 # Python bool
    has_phantom = num_slices * blocks_per_slice != num_blocks     # Python bool

    if last_is_ragged:
        @pl.when(block_id < num_blocks - 1)
        def _full_tiles():
            accumulate(False)

        @pl.when(block_id == num_blocks - 1)
        def _ragged_tail():
            accumulate(True)
        # block_id >= num_blocks (phantom steps of an odd split): skip.
    elif has_phantom:
        @pl.when(block_id < num_blocks)
        def _real_tiles():
            accumulate(False)
    else:
        accumulate(False)


def iou_loss(inputs, targets, smooth=1.0, max_tile_rows=MAX_TILE_ROWS):
    """Pallas IoU loss. `inputs` are logits (any shape), `targets` same shape.

    Native dtypes (bf16 / int / bool) are streamed as-is and cast to f32 after
    load — do NOT cast in the wrapper (it would add a separate HBM copy pass).
    """
    x = inputs.reshape(-1)
    t = targets.reshape(-1)
    n = x.shape[0]

    # Pad only to a multiple of 128 lanes, only when misaligned, with NEUTRAL
    # values: sigmoid(-1e4) == 0 exactly and target 0, so padded lanes add
    # exactly 0 to both sums and need no in-kernel mask.  (Zero-padding of the
    # logits would NOT be neutral: sigmoid(0) = 0.5.)
    rem = n % LANES
    if rem:
        pad = LANES - rem
        x = jnp.pad(x, (0, pad), constant_values=NEG_LOGIT_PAD)
        t = jnp.pad(t, (0, pad), constant_values=0)

    rows = x.shape[0] // LANES
    x2 = x.reshape(rows, LANES)
    t2 = t.reshape(rows, LANES)

    # Tile rows must be a multiple of 8 (BlockSpec sublane constraint); the
    # array's row count may be ragged — the last block is masked in-kernel.
    max_tile_rows = max(SUBLANES, (max_tile_rows // SUBLANES) * SUBLANES)
    rows_rounded = pl.cdiv(rows, SUBLANES) * SUBLANES
    tile_rows = min(max_tile_rows, rows_rounded)

    num_blocks = pl.cdiv(rows, tile_rows)
    num_slices = 2 if num_blocks >= 2 else 1      # v7x: one slice per TensorCore
    blocks_per_slice = pl.cdiv(num_blocks, num_slices)
    valid_rows_last = rows - (num_blocks - 1) * tile_rows

    kernel = functools.partial(
        _iou_kernel,
        tile_rows=tile_rows,
        num_blocks=num_blocks,
        blocks_per_slice=blocks_per_slice,
        num_slices=num_slices,
        valid_rows_last=valid_rows_last,
    )

    def in_map(c, k):
        # Clamp phantom steps (odd block count split over 2 slices) to the last
        # real block; their contribution is skipped inside the kernel.
        return (jnp.minimum(c * blocks_per_slice + k, num_blocks - 1), 0)

    inter_p, total_p = pl.pallas_call(
        kernel,
        out_shape=(
            jax.ShapeDtypeStruct((num_slices, SUBLANES, LANES), jnp.float32),
            jax.ShapeDtypeStruct((num_slices, SUBLANES, LANES), jnp.float32),
        ),
        grid_spec=pltpu.PrefetchScalarGridSpec(
            num_scalar_prefetch=0,
            grid=(num_slices, blocks_per_slice),
            in_specs=[
                pl.BlockSpec((tile_rows, LANES), in_map),
                pl.BlockSpec((tile_rows, LANES), in_map),
            ],
            out_specs=[
                pl.BlockSpec((None, SUBLANES, LANES), lambda c, k: (c, 0, 0)),
                pl.BlockSpec((None, SUBLANES, LANES), lambda c, k: (c, 0, 0)),
            ],
        ),
        compiler_params=pltpu.CompilerParams(
            dimension_semantics=("parallel", "arbitrary"),
            vmem_limit_bytes=VMEM_LIMIT_BYTES,
        ),
    )(x2, t2)

    # Tiny combine + loss formula (a few thousand adds) done in plain JAX.
    inter = jnp.sum(inter_p)
    total = jnp.sum(total_p)
    union = total - inter
    s = jnp.float32(smooth)
    return jnp.float32(1.0) - (inter + s) / (union + s)


def iou_loss_ref(inputs, targets, smooth=1.0):
    """Pure-JAX reference matching the PyTorch module."""
    p = jax.nn.sigmoid(inputs.astype(jnp.float32)).reshape(-1)
    t = targets.astype(jnp.float32).reshape(-1)
    inter = jnp.sum(p * t)
    total = jnp.sum(p + t)
    union = total - inter
    return 1.0 - (inter + smooth) / (union + smooth)


if __name__ == "__main__":
    key = jax.random.PRNGKey(0)

    # 1) Primary example: segmentation logits + binary mask, (N, C, H, W).
    #    Aligned size -> single block, no pad, fully unmasked fast path.
    k1, k2 = jax.random.split(key)
    shape = (2, 4, 16, 16)
    inputs = jax.random.normal(k1, shape, dtype=jnp.float32)
    targets = (jax.random.uniform(k2, shape) > 0.5).astype(jnp.float32)
    loss = jax.block_until_ready(iou_loss(inputs, targets))
    ref = iou_loss_ref(inputs, targets)
    assert jnp.allclose(loss, ref, rtol=1e-5, atol=1e-5), (loss, ref)

    # 2) Ragged size: exercises neutral lane pad + ragged single block row mask.
    k3, k4 = jax.random.split(k2)
    shape2 = (3, 1, 37, 53)
    inputs2 = jax.random.normal(k3, shape2, dtype=jnp.float32)
    targets2 = (jax.random.uniform(k4, shape2) > 0.5).astype(jnp.float32)
    loss2 = jax.block_until_ready(iou_loss(inputs2, targets2))
    ref2 = iou_loss_ref(inputs2, targets2)
    assert jnp.allclose(loss2, ref2, rtol=1e-5, atol=1e-5), (loss2, ref2)

    # 3) Multi-block + 2-slice split + odd block count (phantom step) +
    #    ragged last block, using a small tile so the test stays tiny.
    k5, k6 = jax.random.split(k4)
    shape3 = (7, 131, 157)   # 143,969 elems -> 1125 rows, 5 blocks of 256 rows
    inputs3 = jax.random.normal(k5, shape3, dtype=jnp.float32)
    targets3 = (jax.random.uniform(k6, shape3) > 0.5).astype(jnp.float32)
    loss3 = jax.block_until_ready(iou_loss(inputs3, targets3, max_tile_rows=256))
    ref3 = iou_loss_ref(inputs3, targets3)
    assert jnp.allclose(loss3, ref3, rtol=1e-5, atol=1e-5), (loss3, ref3)

    # 4) Native bf16 logits / bf16 binary targets streamed straight through
    #    (cast to f32 happens after load, inside the kernel).
    k7, k8 = jax.random.split(k6)
    shape4 = (1, 3, 32, 40)
    inputs4 = jax.random.normal(k7, shape4, dtype=jnp.float32).astype(jnp.bfloat16)
    targets4 = (jax.random.uniform(k8, shape4) > 0.5).astype(jnp.bfloat16)
    loss4 = jax.block_until_ready(iou_loss(inputs4, targets4))
    ref4 = iou_loss_ref(inputs4, targets4)
    assert jnp.allclose(loss4, ref4, rtol=1e-5, atol=1e-5), (loss4, ref4)

    print("KERNEL_OK")
</pallas_src>

<mosaic_0001>
module attributes {stable_mosaic.version = 11 : i64} {
  func.func @_iou_kernel(%arg0: i32, %arg1: i32, %arg2: memref<16x128xf32, #tpu.memory_space<vmem>>, %arg3: memref<16x128xf32, #tpu.memory_space<vmem>>, %arg4: memref<1x8x128xf32, #tpu.memory_space<vmem>>, %arg5: memref<1x8x128xf32, #tpu.memory_space<vmem>>) attributes {dimension_semantics = [#tpu.dimension_semantics<parallel>, #tpu.dimension_semantics<arbitrary>], iteration_bounds = array<i64: 1, 1>, scalar_prefetch = 0 : i64, scratch_operands = 0 : i64, tpu.core_type = #tpu.core_type<tc>, window_params = [{transform_indices = @transform_0, window_bounds = array<i64: 16, 128>}, {transform_indices = @transform_1, window_bounds = array<i64: 16, 128>}, {transform_indices = @transform_2, window_bounds = array<i64: 1, 8, 128>}, {transform_indices = @transform_3, window_bounds = array<i64: 1, 8, 128>}]} {
    %c0_i32 = arith.constant 0 : i32
    %0 = arith.cmpi eq, %arg1, %c0_i32 : i32
    %1 = arith.extui %0 : i1 to i32
    %c0_i32_0 = arith.constant 0 : i32
    %2 = arith.cmpi ne, %1, %c0_i32_0 : i32
    scf.if %2 {
      %cst_20 = arith.constant 0.000000e+00 : f32
      %30 = vector.broadcast %cst_20 : f32 to vector<8x128xf32>
      %c0_21 = arith.constant 0 : index
      %c0_22 = arith.constant 0 : index
      %c0_23 = arith.constant 0 : index
      %31 = vector.load %arg4[%c0_21, %c0_22, %c0_23] : memref<1x8x128xf32, #tpu.memory_space<vmem>>, vector<1x8x128xf32>
      %32 = vector.shape_cast %31 : vector<1x8x128xf32> to vector<8x128xf32>
      %33 = vector.shape_cast %30 : vector<8x128xf32> to vector<1x8x128xf32>
      tpu.vector_store %arg4[%c0_21, %c0_22, %c0_23], %33 {strides = array<i32>} : memref<1x8x128xf32, #tpu.memory_space<vmem>>, vector<1x8x128xf32>,
      %cst_24 = arith.constant 0.000000e+00 : f32
      %34 = vector.broadcast %cst_24 : f32 to vector<8x128xf32>
      %c0_25 = arith.constant 0 : index
      %c0_26 = arith.constant 0 : index
      %c0_27 = arith.constant 0 : index
      %35 = vector.load %arg5[%c0_25, %c0_26, %c0_27] : memref<1x8x128xf32, #tpu.memory_space<vmem>>, vector<1x8x128xf32>
      %36 = vector.shape_cast %35 : vector<1x8x128xf32> to vector<8x128xf32>
      %37 = vector.shape_cast %34 : vector<8x128xf32> to vector<1x8x128xf32>
      tpu.vector_store %arg5[%c0_25, %c0_26, %c0_27], %37 {strides = array<i32>} : memref<1x8x128xf32, #tpu.memory_space<vmem>>, vector<1x8x128xf32>,
    } else {
    }
    %c0 = arith.constant 0 : index
    %c0_1 = arith.constant 0 : index
    %3 = vector.load %arg2[%c0, %c0_1] : memref<16x128xf32, #tpu.memory_space<vmem>>, vector<16x128xf32>
    %c0_2 = arith.constant 0 : index
    %c0_3 = arith.constant 0 : index
    %4 = vector.load %arg3[%c0_2, %c0_3] : memref<16x128xf32, #tpu.memory_space<vmem>>, vector<16x128xf32>
    %cst = arith.constant 5.000000e-01 : f32
    %5 = vector.broadcast %cst : f32 to vector<16x128xf32>
    %6 = arith.mulf %5, %3 : vector<16x128xf32>
    %7 = math.tanh %6 : vector<16x128xf32>
    %cst_4 = arith.constant 1.000000e+00 : f32
    %8 = vector.broadcast %cst_4 : f32 to vector<16x128xf32>
    %9 = arith.addf %7, %8 : vector<16x128xf32>
    %cst_5 = arith.constant 5.000000e-01 : f32
    %10 = vector.broadcast %cst_5 : f32 to vector<16x128xf32>
    %11 = arith.mulf %10, %9 : vector<16x128xf32>
    %c0_6 = arith.constant 0 : index
    %c0_7 = arith.constant 0 : index
    %c0_8 = arith.constant 0 : index
    %12 = vector.load %arg4[%c0_6, %c0_7, %c0_8] : memref<1x8x128xf32, #tpu.memory_space<vmem>>, vector<1x8x128xf32>
    %13 = vector.shape_cast %12 : vector<1x8x128xf32> to vector<8x128xf32>
    %14 = arith.mulf %11, %4 : vector<16x128xf32>
    %15 = vector.shape_cast %14 : vector<16x128xf32> to vector<2x8x128xf32>
    %cst_9 = arith.constant dense<0.000000e+00> : vector<8x128xf32>
    %16 = vector.multi_reduction <add>, %15, %cst_9 [0] : vector<2x8x128xf32> to vector<8x128xf32>
    %17 = arith.addf %13, %16 : vector<8x128xf32>
    %c0_10 = arith.constant 0 : index
    %c0_11 = arith.constant 0 : index
    %c0_12 = arith.constant 0 : index
    %18 = vector.load %arg4[%c0_10, %c0_11, %c0_12] : memref<1x8x128xf32, #tpu.memory_space<vmem>>, vector<1x8x128xf32>
    %19 = vector.shape_cast %18 : vector<1x8x128xf32> to vector<8x128xf32>
    %20 = vector.shape_cast %17 : vector<8x128xf32> to vector<1x8x128xf32>
    tpu.vector_store %arg4[%c0_10, %c0_11, %c0_12], %20 {strides = array<i32>} : memref<1x8x128xf32, #tpu.memory_space<vmem>>, vector<1x8x128xf32>,
    %c0_13 = arith.constant 0 : index
    %c0_14 = arith.constant 0 : index
    %c0_15 = arith.constant 0 : index
    %21 = vector.load %arg5[%c0_13, %c0_14, %c0_15] : memref<1x8x128xf32, #tpu.memory_space<vmem>>, vector<1x8x128xf32>
    %22 = vector.shape_cast %21 : vector<1x8x128xf32> to vector<8x128xf32>
    %23 = arith.addf %11, %4 : vector<16x128xf32>
    %24 = vector.shape_cast %23 : vector<16x128xf32> to vector<2x8x128xf32>
    %cst_16 = arith.constant dense<0.000000e+00> : vector<8x128xf32>
    %25 = vector.multi_reduction <add>, %24, %cst_16 [0] : vector<2x8x128xf32> to vector<8x128xf32>
    %26 = arith.addf %22, %25 : vector<8x128xf32>
    %c0_17 = arith.constant 0 : index
    %c0_18 = arith.constant 0 : index
    %c0_19 = arith.constant 0 : index
    %27 = vector.load %arg5[%c0_17, %c0_18, %c0_19] : memref<1x8x128xf32, #tpu.memory_space<vmem>>, vector<1x8x128xf32>
    %28 = vector.shape_cast %27 : vector<1x8x128xf32> to vector<8x128xf32>
    %29 = vector.shape_cast %26 : vector<8x128xf32> to vector<1x8x128xf32>
    tpu.vector_store %arg5[%c0_17, %c0_18, %c0_19], %29 {strides = array<i32>} : memref<1x8x128xf32, #tpu.memory_space<vmem>>, vector<1x8x128xf32>,
    return
  }
  func.func @transform_0(%arg0: i32, %arg1: i32) -> (i32, i32) {
    %c1_i32 = arith.constant 1 : i32
    %0 = arith.muli %arg0, %c1_i32 : i32
    %1 = arith.addi %0, %arg1 : i32
    %c0_i32 = arith.constant 0 : i32
    %2 = arith.minsi %1, %c0_i32 : i32
    %c0_i32_0 = arith.constant 0 : i32
    %c0_i32_1 = arith.constant 0 : i32
    return %2, %c0_i32_0 : i32, i32
  }
  func.func @transform_1(%arg0: i32, %arg1: i32) -> (i32, i32) {
    %c1_i32 = arith.constant 1 : i32
    %0 = arith.muli %arg0, %c1_i32 : i32
    %1 = arith.addi %0, %arg1 : i32
    %c0_i32 = arith.constant 0 : i32
    %2 = arith.minsi %1, %c0_i32 : i32
    %c0_i32_0 = arith.constant 0 : i32
    %c0_i32_1 = arith.constant 0 : i32
    return %2, %c0_i32_0 : i32, i32
  }
  func.func @transform_2(%arg0: i32, %arg1: i32) -> (i32, i32, i32) {
    %c0_i32 = arith.constant 0 : i32
    %c0_i32_0 = arith.constant 0 : i32
    %c0_i32_1 = arith.constant 0 : i32
    return %arg0, %c0_i32, %c0_i32_0 : i32, i32, i32
  }
  func.func @transform_3(%arg0: i32, %arg1: i32) -> (i32, i32, i32) {
    %c0_i32 = arith.constant 0 : i32
    %c0_i32_0 = arith.constant 0 : i32
    %c0_i32_1 = arith.constant 0 : i32
    return %arg0, %c0_i32, %c0_i32_0 : i32, i32, i32
  }
}

</mosaic_0001>

<bundles_post_ra>
// kernel: tpu_custom_call.1
= control target key start
LH: loop header
LB: loop body
LE: loop exit
PB: predicated region body
PF: predicated region fallthrough
CT: control target
= control target key end

     0   :  { %9 = vsyncpa [#allocation3], 0  ;;  %s264_s0 = inlined_call_operand.hbm [shape: f32[16,128], index: 0, kind: input, shape index: {}]   ;;  %s265_s1 = inlined_call_operand.hbm [shape: f32[16,128], index: 1, kind: input, shape index: {}]   ;;  %s266_s2 = inlined_call_operand.hbm [shape: f32[1,8,128], index: 2, kind: output, shape index: {0}]   ;;  %s267_s3 = inlined_call_operand.hbm [shape: f32[1,8,128], index: 3, kind: output, shape index: {1}]  }
   0x1   :  { %10 = vsyncpa [#allocation6], 0 }
   0x2   :  { %11 = vsyncpa [#allocation4], 0 }
   0x3   :  { %12 = vsyncpa [#allocation9], 0  ;;  %s226_s12 = smov [#allocation2]  }
   0x4   :  { %s24_s13 = sshll.u32 %s226_s12, 4  ;;  %s25_s13 = int_to_ptr.vmem [resolvable:$true] %s24_s13 }
   0x5   :  { %s146_s14 = scalar_lea.vmem %s25_s13, 256  ;;  %p151_p1 = scmp.lt.s32.totalorder %s25_s13, %s25_s13 }
   0x6   :  { %p147_p0 = scmp.ne.s32.totalorder %s25_s13, %s146_s14  ;;  %p152_p2 = scmp.lt.s32.totalorder %s146_s14, %s146_s14 }
   0x8   :  { %p153_p3 = por %p152_p2, %p151_p1 }
   0xa   :  { %p154_p4 = pnand %p153_p3, %p147_p0 }
   0xc   :  { %157 = shalt.err (!%p154_p4)
}
   0xd   :  { %s227_s15 = smov 128   ;;  %s228_s16 = smov 8  }
   0xe   :  { %30 = dma.hbm_to_vmem [thread:$0]  %s264_s0, 256, %s25_s13, [#allocation3], %s227_s15, %s227_s15, %s228_s16  }
   0xf   :  { %s229_s19 = smov [#allocation5]  }
  0x10   :  { %s42_s20 = sshll.u32 %s229_s19, 4  ;;  %s43_s20 = int_to_ptr.vmem [resolvable:$true] %s42_s20 }
  0x11   :  { %s166_s21 = scalar_lea.vmem %s43_s20, 256  ;;  %p171_p6 = scmp.lt.s32.totalorder %s43_s20, %s43_s20 }
  0x12   :  { %p167_p5 = scmp.ne.s32.totalorder %s43_s20, %s166_s21  ;;  %p172_p7 = scmp.lt.s32.totalorder %s166_s21, %s166_s21 }
  0x14   :  { %p173_p8 = por %p172_p7, %p171_p6 }
  0x16   :  { %p174_p9 = pnand %p173_p8, %p167_p5 }
  0x18   :  { %177 = shalt.err (!%p174_p9)
}
  0x19   :  { %48 = dma.hbm_to_vmem [thread:$0]  %s265_s1, 256, %s43_s20, [#allocation6], %s227_s15, %s227_s15, %s228_s16  }
  0x1a   :  { %218 = dma.done.wait [#allocation3], 256  }
  0x1b   :  { %219 = vsyncadd [#allocation3], 4294967040 }
  0x1c   :  { %220 = dma.done.wait [#allocation6], 256  }
  0x1d   :  { %221 = vsyncadd [#allocation6], 4294967040  ;;  %v69_v0 = vld [vmem:[#allocation2] sm:$0xff]  ;;  %v70_v1 = vld [vmem:[#allocation2 + $0x8] sm:$0xff]  ;;  %s230_s0 = smov [#allocation7]   ;;  %s231_s24 = smov [#allocation8]  }
  0x1e   :  { %v73_v2 = vmul.f32 0.5, %v69_v0  ;;  %v74_v3 = vmul.f32 0.5, %v70_v1  ;;  %v71_v7 = vld [vmem:[#allocation5] sm:$0xff]  ;;  %v72_v9 = vld [vmem:[#allocation5 + $0x8] sm:$0xff]  ;;  %s99_s1 = sshll.u32 %s230_s0, 4  ;;  %s109_s25 = sshll.u32 %s231_s24, 4  ;;  %s100_s1 = int_to_ptr.vmem [resolvable:$true] %s99_s1  ;;  %s110_s25 = int_to_ptr.vmem [resolvable:$true] %s109_s25 }
  0x1f   :  { %s178_s26 = scalar_lea.vmem %s100_s1, 128  ;;  %p183_p11 = scmp.lt.s32.totalorder %s100_s1, %s100_s1 }
  0x20   :  { %134 = vtanh.f32 %v73_v2  ;;  %p179_p10 = scmp.ne.s32.totalorder %s100_s1, %s178_s26  ;;  %p184_p12 = scmp.lt.s32.totalorder %s178_s26, %s178_s26 }
  0x21   :  { %136 = vtanh.f32 %v74_v3 }
  0x22   :  { %p185_p13 = por %p184_p12, %p183_p11 }
  0x24   :  { %p186_p0 = pnand %p185_p13, %p179_p10 }
  0x2d   :  { %v135_v4 = vpop.eup %134 }
  0x2e   :  { %v137_v5 = vpop.eup %136  ;;  %v77_v6 = vadd.f32 1.0, %v135_v4 }
  0x2f   :  { %v78_v8 = vadd.f32 1.0, %v137_v5 }
  0x30   :  { %v79_v10 = vmul.f32 0.5, %v77_v6 }
  0x31   :  { %v80_v11 = vmul.f32 0.5, %v78_v8 }
  0x32   :  { %v82_v12 = vmul.f32 %v79_v10, %v71_v7  ;;  %v88_v13 = vadd.f32 %v79_v10, %v71_v7 }
  0x33   :  { %v83_v14 = vmul.f32 %v80_v11, %v72_v9  ;;  %v89_v15 = vadd.f32 %v80_v11, %v72_v9 }
  0x35   :  { %v84_v16 = vadd.f32 %v83_v14, %v82_v12  ;;  %v90_v17 = vadd.f32 %v89_v15, %v88_v13 }
  0x37   :  { %86 = vst [vmem:[#allocation7] sm:$0xff] %v84_v16  ;;  %92 = vst [vmem:[#allocation8] sm:$0xff] %v90_v17 }
  0x38   :  { %189 = shalt.err (!%p186_p0)
}
  0x39   :  { %102 = dma.vmem_to_hbm [thread:$0]  %s100_s1, 128, %s266_s2, [#allocation4]  }
  0x3a   :  { %s198_s29 = scalar_lea.vmem %s110_s25, 128  ;;  %p203_p2 = scmp.lt.s32.totalorder %s110_s25, %s110_s25 }
  0x3b   :  { %p199_p1 = scmp.ne.s32.totalorder %s110_s25, %s198_s29  ;;  %p204_p3 = scmp.lt.s32.totalorder %s198_s29, %s198_s29 }
  0x3d   :  { %p205_p4 = por %p204_p3, %p203_p2 }
  0x3f   :  { %p206_p5 = pnand %p205_p4, %p199_p1 }
  0x41   :  { %209 = shalt.err (!%p206_p5)
}
  0x42   :  { %112 = dma.vmem_to_hbm [thread:$0]  %s110_s25, 128, %s267_s3, [#allocation9]  }
  0x43   :  { %222 = dma.done.wait [#allocation4], 128  }
  0x44   :  { %223 = vsyncadd [#allocation4], 4294967168 }
  0x45   :  { %224 = dma.done.wait [#allocation9], 128  }
  0x46   :  { %225 = vsyncadd [#allocation9], 4294967168 }
  0x47   :  { %119 = vsyncpa [#allocation3], 1 }
  0x48   :  { %120 = vsyncpa [#allocation6], 1 }
  0x49   :  { %121 = vsyncpa [#allocation4], 1 }
  0x4a   :  { %122 = vsyncpa [#allocation9], 1 }

</bundles_post_ra>
